<compile_context>
chip_gen: v5e
topology: v5e:2x2
jax: 0.10.0
libtpu: 0.0.40
codegen_flags: <defaults>
</compile_context>

<pallas_src>
import functools

import jax
import jax.numpy as jnp
from jax.experimental import pallas as pl
from jax.experimental.pallas import tpu as pltpu


def _sigmoid(v):
    # exp on the EUP; reciprocal also pushed to the EUP slot (approx vrcp).
    return pl.reciprocal(1.0 + jnp.exp(-v), approx=True)


def _gru_fc_kernel(x_ref, wih_ref, whh_ref, bih_ref, bhh_ref, wfc_ref, bfc_ref,
                   out_ref, *, batch, t_steps):
    # x_ref:   (T*B, D)  time-major flattened input        (caller dtype)
    # wih_ref: (3, D, H)  input-projection weights, gate-major
    # whh_ref: (3, H, H)  recurrent weights, gate-major
    # bih_ref/bhh_ref: (3, 1, H)
    # wfc_ref: (H, O), bfc_ref: (1, O)
    # out_ref: (B, O)
    x2 = x_ref[...]                                            # (T*B, D)

    # ---- Hoisted input projection: one big matmul per gate (M = T*B). ----
    def in_proj(g):
        gi = jnp.dot(x2, wih_ref[g], preferred_element_type=jnp.float32)
        return gi + bih_ref[g].astype(jnp.float32)             # (T*B, H)

    gi_r, gi_z, gi_n = in_proj(0), in_proj(1), in_proj(2)

    # Recurrent weights/biases read once (VMEM-resident across the loop).
    w_hr, w_hz, w_hn = whh_ref[0], whh_ref[1], whh_ref[2]
    b_hr = bhh_ref[0].astype(jnp.float32)
    b_hz = bhh_ref[1].astype(jnp.float32)
    b_hn = bhh_ref[2].astype(jnp.float32)

    hidden = w_hr.shape[-1]
    h = jnp.zeros((batch, hidden), jnp.float32)

    # ---- Sequential recurrence, fully unrolled (T is small & static). ----
    for t in range(t_steps):
        rows = slice(t * batch, (t + 1) * batch)               # static slice
        h_r = jnp.dot(h, w_hr, preferred_element_type=jnp.float32) + b_hr
        h_z = jnp.dot(h, w_hz, preferred_element_type=jnp.float32) + b_hz
        h_n = jnp.dot(h, w_hn, preferred_element_type=jnp.float32) + b_hn
        r = _sigmoid(gi_r[rows, :] + h_r)
        z = _sigmoid(gi_z[rows, :] + h_z)
        n = jnp.tanh(gi_n[rows, :] + r * h_n)
        h = (1.0 - z) * n + z * h

    # ---- Fused head: fc(relu(out[:, -1, :])). ----
    act = jnp.maximum(h, 0.0)
    y = (jnp.dot(act, wfc_ref[...], preferred_element_type=jnp.float32)
         + bfc_ref[...].astype(jnp.float32))
    out_ref[...] = y.astype(out_ref.dtype)


@jax.jit
def gru_model_forward(x, w_ih, w_hh, b_ih, b_hh, w_fc, b_fc):
    """x: (B, T, D), batch_first. Weights in PyTorch layout:
       w_ih (3H, D), w_hh (3H, H), b_ih/b_hh (3H,), w_fc (O, H), b_fc (O,)."""
    B, T, D = x.shape
    H = w_hh.shape[1]
    O = w_fc.shape[0]

    # One-time layout plumbing on tiny tensors (outside the kernel):
    #   * x flattened time-major so the hoisted input projection is a single
    #     2-D matmul and each timestep is a contiguous row block;
    #   * gate weights get a leading size-3 axis (no lane-offset gate slicing).
    x_tb = jnp.transpose(x, (1, 0, 2)).reshape(T * B, D)        # (T*B, D)
    wih3 = jnp.transpose(w_ih.reshape(3, H, D), (0, 2, 1))      # (3, D, H)
    whh3 = jnp.transpose(w_hh.reshape(3, H, H), (0, 2, 1))      # (3, H, H)
    bih3 = b_ih.reshape(3, 1, H)
    bhh3 = b_hh.reshape(3, 1, H)
    wfc_t = jnp.transpose(w_fc)                                 # (H, O)
    bfc2 = b_fc.reshape(1, O)

    kernel = functools.partial(_gru_fc_kernel, batch=B, t_steps=T)
    vmem = lambda: pl.BlockSpec(memory_space=pltpu.MemorySpace.VMEM)

    return pl.pallas_call(
        kernel,
        out_shape=jax.ShapeDtypeStruct((B, O), x.dtype),
        in_specs=[vmem() for _ in range(7)],     # everything VMEM-resident
        out_specs=vmem(),
    )(x_tb, wih3, whh3, bih3, bhh3, wfc_t, bfc2)


def gru_model_reference(x, w_ih, w_hh, b_ih, b_hh, w_fc, b_fc):
    """Pure-JAX reference of the same forward (f32, highest matmul precision)."""
    B, T, _ = x.shape
    H = w_hh.shape[1]
    hp = jax.lax.Precision.HIGHEST
    h = jnp.zeros((B, H), jnp.float32)
    for t in range(T):
        x_t = x[:, t, :].astype(jnp.float32)
        gi = jnp.dot(x_t, w_ih.T.astype(jnp.float32), precision=hp) + b_ih
        gh = jnp.dot(h, w_hh.T.astype(jnp.float32), precision=hp) + b_hh
        i_r, i_z, i_n = jnp.split(gi, 3, axis=-1)
        h_r, h_z, h_n = jnp.split(gh, 3, axis=-1)
        r = jax.nn.sigmoid(i_r + h_r)
        z = jax.nn.sigmoid(i_z + h_z)
        n = jnp.tanh(i_n + r * h_n)
        h = (1.0 - z) * n + z * h
    out = jnp.dot(jnp.maximum(h, 0.0), w_fc.T.astype(jnp.float32), precision=hp) + b_fc
    return out.astype(x.dtype)


if __name__ == "__main__":
    # batch=2, seq=8, input_dim=16, hidden_dim=32, layer_dim=1, output_dim=8
    B, T, D, H, O = 2, 8, 16, 32, 8

    key = jax.random.PRNGKey(0)
    ks = jax.random.split(key, 7)
    k = 1.0 / float(H) ** 0.5                    # PyTorch-style U(-1/sqrt(H), 1/sqrt(H))
    x = jax.random.normal(ks[0], (B, T, D), dtype=jnp.float32)
    w_ih = jax.random.uniform(ks[1], (3 * H, D), jnp.float32, -k, k)
    w_hh = jax.random.uniform(ks[2], (3 * H, H), jnp.float32, -k, k)
    b_ih = jax.random.uniform(ks[3], (3 * H,), jnp.float32, -k, k)
    b_hh = jax.random.uniform(ks[4], (3 * H,), jnp.float32, -k, k)
    w_fc = jax.random.uniform(ks[5], (O, H), jnp.float32, -k, k)
    b_fc = jax.random.uniform(ks[6], (O,), jnp.float32, -k, k)

    y = gru_model_forward(x, w_ih, w_hh, b_ih, b_hh, w_fc, b_fc)
    jax.block_until_ready(y)

    y_ref = gru_model_reference(x, w_ih, w_hh, b_ih, b_hh, w_fc, b_fc)
    assert y.shape == (B, O)
    # Tolerance covers default-precision MXU passes + approx reciprocal in
    # sigmoid; structural bugs (gate order, missing bias/relu) give errors
    # orders of magnitude larger.
    assert jnp.allclose(y, y_ref, atol=3e-2, rtol=3e-2), (
        f"mismatch vs reference: max abs err {jnp.max(jnp.abs(y - y_ref))}")
    print("KERNEL_OK")
</pallas_src>

<mosaic_0001>
module attributes {stable_mosaic.version = 11 : i64} {
  func.func @_gru_fc_kernel(%arg0: memref<16x16xf32, #tpu.memory_space<vmem>>, %arg1: memref<3x16x32xf32, #tpu.memory_space<vmem>>, %arg2: memref<3x32x32xf32, #tpu.memory_space<vmem>>, %arg3: memref<3x1x32xf32, #tpu.memory_space<vmem>>, %arg4: memref<3x1x32xf32, #tpu.memory_space<vmem>>, %arg5: memref<32x8xf32, #tpu.memory_space<vmem>>, %arg6: memref<1x8xf32, #tpu.memory_space<vmem>>, %arg7: memref<2x8xf32, #tpu.memory_space<vmem>>) attributes {dimension_semantics = [], scalar_prefetch = 0 : i64, scratch_operands = 0 : i64, tpu.core_type = #tpu.core_type<tc>} {
    %c0 = arith.constant 0 : index
    %c0_0 = arith.constant 0 : index
    %0 = vector.load %arg0[%c0, %c0_0] : memref<16x16xf32, #tpu.memory_space<vmem>>, vector<16x16xf32>
    %c0_1 = arith.constant 0 : index
    %c0_2 = arith.constant 0 : index
    %c0_3 = arith.constant 0 : index
    %1 = vector.load %arg1[%c0_1, %c0_2, %c0_3] : memref<3x16x32xf32, #tpu.memory_space<vmem>>, vector<1x16x32xf32>
    %2 = vector.shape_cast %1 : vector<1x16x32xf32> to vector<16x32xf32>
    %cst = arith.constant dense<0.000000e+00> : vector<16x32xf32>
    %3 = tpu.matmul %0, %2, %cst {dimension_numbers = #tpu.dot_dimension_numbers<[1], [0], [0], [1], [0, 0, 1, 1], [], []>} : vector<16x16xf32>, vector<16x32xf32>, vector<16x32xf32> -> vector<16x32xf32>
    %c0_4 = arith.constant 0 : index
    %c0_5 = arith.constant 0 : index
    %c0_6 = arith.constant 0 : index
    %4 = vector.load %arg3[%c0_4, %c0_5, %c0_6] : memref<3x1x32xf32, #tpu.memory_space<vmem>>, vector<1x1x32xf32>
    %5 = vector.shape_cast %4 : vector<1x1x32xf32> to vector<1x32xf32>
    %6 = vector.broadcast %5 : vector<1x32xf32> to vector<16x32xf32>
    %7 = arith.addf %3, %6 : vector<16x32xf32>
    %c1 = arith.constant 1 : index
    %c0_7 = arith.constant 0 : index
    %c0_8 = arith.constant 0 : index
    %8 = vector.load %arg1[%c1, %c0_7, %c0_8] : memref<3x16x32xf32, #tpu.memory_space<vmem>>, vector<1x16x32xf32>
    %9 = vector.shape_cast %8 : vector<1x16x32xf32> to vector<16x32xf32>
    %cst_9 = arith.constant dense<0.000000e+00> : vector<16x32xf32>
    %10 = tpu.matmul %0, %9, %cst_9 {dimension_numbers = #tpu.dot_dimension_numbers<[1], [0], [0], [1], [0, 0, 1, 1], [], []>} : vector<16x16xf32>, vector<16x32xf32>, vector<16x32xf32> -> vector<16x32xf32>
    %c1_10 = arith.constant 1 : index
    %c0_11 = arith.constant 0 : index
    %c0_12 = arith.constant 0 : index
    %11 = vector.load %arg3[%c1_10, %c0_11, %c0_12] : memref<3x1x32xf32, #tpu.memory_space<vmem>>, vector<1x1x32xf32>
    %12 = vector.shape_cast %11 : vector<1x1x32xf32> to vector<1x32xf32>
    %13 = vector.broadcast %12 : vector<1x32xf32> to vector<16x32xf32>
    %14 = arith.addf %10, %13 : vector<16x32xf32>
    %c2 = arith.constant 2 : index
    %c0_13 = arith.constant 0 : index
    %c0_14 = arith.constant 0 : index
    %15 = vector.load %arg1[%c2, %c0_13, %c0_14] : memref<3x16x32xf32, #tpu.memory_space<vmem>>, vector<1x16x32xf32>
    %16 = vector.shape_cast %15 : vector<1x16x32xf32> to vector<16x32xf32>
    %cst_15 = arith.constant dense<0.000000e+00> : vector<16x32xf32>
    %17 = tpu.matmul %0, %16, %cst_15 {dimension_numbers = #tpu.dot_dimension_numbers<[1], [0], [0], [1], [0, 0, 1, 1], [], []>} : vector<16x16xf32>, vector<16x32xf32>, vector<16x32xf32> -> vector<16x32xf32>
    %c2_16 = arith.constant 2 : index
    %c0_17 = arith.constant 0 : index
    %c0_18 = arith.constant 0 : index
    %18 = vector.load %arg3[%c2_16, %c0_17, %c0_18] : memref<3x1x32xf32, #tpu.memory_space<vmem>>, vector<1x1x32xf32>
    %19 = vector.shape_cast %18 : vector<1x1x32xf32> to vector<1x32xf32>
    %20 = vector.broadcast %19 : vector<1x32xf32> to vector<16x32xf32>
    %21 = arith.addf %17, %20 : vector<16x32xf32>
    %c0_19 = arith.constant 0 : index
    %c0_20 = arith.constant 0 : index
    %c0_21 = arith.constant 0 : index
    %22 = vector.load %arg2[%c0_19, %c0_20, %c0_21] : memref<3x32x32xf32, #tpu.memory_space<vmem>>, vector<1x32x32xf32>
    %23 = vector.shape_cast %22 : vector<1x32x32xf32> to vector<32x32xf32>
    %c1_22 = arith.constant 1 : index
    %c0_23 = arith.constant 0 : index
    %c0_24 = arith.constant 0 : index
    %24 = vector.load %arg2[%c1_22, %c0_23, %c0_24] : memref<3x32x32xf32, #tpu.memory_space<vmem>>, vector<1x32x32xf32>
    %25 = vector.shape_cast %24 : vector<1x32x32xf32> to vector<32x32xf32>
    %c2_25 = arith.constant 2 : index
    %c0_26 = arith.constant 0 : index
    %c0_27 = arith.constant 0 : index
    %26 = vector.load %arg2[%c2_25, %c0_26, %c0_27] : memref<3x32x32xf32, #tpu.memory_space<vmem>>, vector<1x32x32xf32>
    %27 = vector.shape_cast %26 : vector<1x32x32xf32> to vector<32x32xf32>
    %c0_28 = arith.constant 0 : index
    %c0_29 = arith.constant 0 : index
    %c0_30 = arith.constant 0 : index
    %28 = vector.load %arg4[%c0_28, %c0_29, %c0_30] : memref<3x1x32xf32, #tpu.memory_space<vmem>>, vector<1x1x32xf32>
    %29 = vector.shape_cast %28 : vector<1x1x32xf32> to vector<1x32xf32>
    %c1_31 = arith.constant 1 : index
    %c0_32 = arith.constant 0 : index
    %c0_33 = arith.constant 0 : index
    %30 = vector.load %arg4[%c1_31, %c0_32, %c0_33] : memref<3x1x32xf32, #tpu.memory_space<vmem>>, vector<1x1x32xf32>
    %31 = vector.shape_cast %30 : vector<1x1x32xf32> to vector<1x32xf32>
    %c2_34 = arith.constant 2 : index
    %c0_35 = arith.constant 0 : index
    %c0_36 = arith.constant 0 : index
    %32 = vector.load %arg4[%c2_34, %c0_35, %c0_36] : memref<3x1x32xf32, #tpu.memory_space<vmem>>, vector<1x1x32xf32>
    %33 = vector.shape_cast %32 : vector<1x1x32xf32> to vector<1x32xf32>
    %cst_37 = arith.constant 0.000000e+00 : f32
    %34 = vector.broadcast %cst_37 : f32 to vector<2x32xf32>
    %cst_38 = arith.constant dense<0.000000e+00> : vector<2x32xf32>
    %35 = tpu.matmul %34, %23, %cst_38 {dimension_numbers = #tpu.dot_dimension_numbers<[1], [0], [0], [1], [0, 0, 1, 1], [], []>} : vector<2x32xf32>, vector<32x32xf32>, vector<2x32xf32> -> vector<2x32xf32>
    %36 = vector.broadcast %29 : vector<1x32xf32> to vector<2x32xf32>
    %37 = arith.addf %35, %36 : vector<2x32xf32>
    %cst_39 = arith.constant dense<0.000000e+00> : vector<2x32xf32>
    %38 = tpu.matmul %34, %25, %cst_39 {dimension_numbers = #tpu.dot_dimension_numbers<[1], [0], [0], [1], [0, 0, 1, 1], [], []>} : vector<2x32xf32>, vector<32x32xf32>, vector<2x32xf32> -> vector<2x32xf32>
    %39 = vector.broadcast %31 : vector<1x32xf32> to vector<2x32xf32>
    %40 = arith.addf %38, %39 : vector<2x32xf32>
    %cst_40 = arith.constant dense<0.000000e+00> : vector<2x32xf32>
    %41 = tpu.matmul %34, %27, %cst_40 {dimension_numbers = #tpu.dot_dimension_numbers<[1], [0], [0], [1], [0, 0, 1, 1], [], []>} : vector<2x32xf32>, vector<32x32xf32>, vector<2x32xf32> -> vector<2x32xf32>
    %42 = vector.broadcast %33 : vector<1x32xf32> to vector<2x32xf32>
    %43 = arith.addf %41, %42 : vector<2x32xf32>
    %44 = vector.extract_strided_slice %7 {offsets = [0, 0], sizes = [2, 32], strides = [1, 1]} : vector<16x32xf32> to vector<2x32xf32>
    %45 = arith.addf %44, %37 : vector<2x32xf32>
    %cst_41 = arith.constant 0.000000e+00 : f32
    %46 = vector.broadcast %cst_41 : f32 to vector<2x32xf32>
    %47 = arith.subf %46, %45 : vector<2x32xf32>
    %48 = math.exp %47 : vector<2x32xf32>
    %cst_42 = arith.constant 1.000000e+00 : f32
    %49 = vector.broadcast %cst_42 : f32 to vector<2x32xf32>
    %50 = arith.addf %49, %48 : vector<2x32xf32>
    %51 = tpu.reciprocal %50 {approx = true} : vector<2x32xf32> -> vector<2x32xf32>
    %52 = vector.extract_strided_slice %14 {offsets = [0, 0], sizes = [2, 32], strides = [1, 1]} : vector<16x32xf32> to vector<2x32xf32>
    %53 = arith.addf %52, %40 : vector<2x32xf32>
    %cst_43 = arith.constant 0.000000e+00 : f32
    %54 = vector.broadcast %cst_43 : f32 to vector<2x32xf32>
    %55 = arith.subf %54, %53 : vector<2x32xf32>
    %56 = math.exp %55 : vector<2x32xf32>
    %cst_44 = arith.constant 1.000000e+00 : f32
    %57 = vector.broadcast %cst_44 : f32 to vector<2x32xf32>
    %58 = arith.addf %57, %56 : vector<2x32xf32>
    %59 = tpu.reciprocal %58 {approx = true} : vector<2x32xf32> -> vector<2x32xf32>
    %60 = vector.extract_strided_slice %21 {offsets = [0, 0], sizes = [2, 32], strides = [1, 1]} : vector<16x32xf32> to vector<2x32xf32>
    %61 = arith.mulf %51, %43 : vector<2x32xf32>
    %62 = arith.addf %60, %61 : vector<2x32xf32>
    %63 = math.tanh %62 : vector<2x32xf32>
    %cst_45 = arith.constant 1.000000e+00 : f32
    %64 = vector.broadcast %cst_45 : f32 to vector<2x32xf32>
    %65 = arith.subf %64, %59 : vector<2x32xf32>
    %66 = arith.mulf %65, %63 : vector<2x32xf32>
    %67 = arith.mulf %59, %34 : vector<2x32xf32>
    %68 = arith.addf %66, %67 : vector<2x32xf32>
    %cst_46 = arith.constant dense<0.000000e+00> : vector<2x32xf32>
    %69 = tpu.matmul %68, %23, %cst_46 {dimension_numbers = #tpu.dot_dimension_numbers<[1], [0], [0], [1], [0, 0, 1, 1], [], []>} : vector<2x32xf32>, vector<32x32xf32>, vector<2x32xf32> -> vector<2x32xf32>
    %70 = vector.broadcast %29 : vector<1x32xf32> to vector<2x32xf32>
    %71 = arith.addf %69, %70 : vector<2x32xf32>
    %cst_47 = arith.constant dense<0.000000e+00> : vector<2x32xf32>
    %72 = tpu.matmul %68, %25, %cst_47 {dimension_numbers = #tpu.dot_dimension_numbers<[1], [0], [0], [1], [0, 0, 1, 1], [], []>} : vector<2x32xf32>, vector<32x32xf32>, vector<2x32xf32> -> vector<2x32xf32>
    %73 = vector.broadcast %31 : vector<1x32xf32> to vector<2x32xf32>
    %74 = arith.addf %72, %73 : vector<2x32xf32>
    %cst_48 = arith.constant dense<0.000000e+00> : vector<2x32xf32>
    %75 = tpu.matmul %68, %27, %cst_48 {dimension_numbers = #tpu.dot_dimension_numbers<[1], [0], [0], [1], [0, 0, 1, 1], [], []>} : vector<2x32xf32>, vector<32x32xf32>, vector<2x32xf32> -> vector<2x32xf32>
    %76 = vector.broadcast %33 : vector<1x32xf32> to vector<2x32xf32>
    %77 = arith.addf %75, %76 : vector<2x32xf32>
    %78 = vector.extract_strided_slice %7 {offsets = [2, 0], sizes = [2, 32], strides = [1, 1]} : vector<16x32xf32> to vector<2x32xf32>
    %79 = arith.addf %78, %71 : vector<2x32xf32>
    %cst_49 = arith.constant 0.000000e+00 : f32
    %80 = vector.broadcast %cst_49 : f32 to vector<2x32xf32>
    %81 = arith.subf %80, %79 : vector<2x32xf32>
    %82 = math.exp %81 : vector<2x32xf32>
    %cst_50 = arith.constant 1.000000e+00 : f32
    %83 = vector.broadcast %cst_50 : f32 to vector<2x32xf32>
    %84 = arith.addf %83, %82 : vector<2x32xf32>
    %85 = tpu.reciprocal %84 {approx = true} : vector<2x32xf32> -> vector<2x32xf32>
    %86 = vector.extract_strided_slice %14 {offsets = [2, 0], sizes = [2, 32], strides = [1, 1]} : vector<16x32xf32> to vector<2x32xf32>
    %87 = arith.addf %86, %74 : vector<2x32xf32>
    %cst_51 = arith.constant 0.000000e+00 : f32
    %88 = vector.broadcast %cst_51 : f32 to vector<2x32xf32>
    %89 = arith.subf %88, %87 : vector<2x32xf32>
    %90 = math.exp %89 : vector<2x32xf32>
    %cst_52 = arith.constant 1.000000e+00 : f32
    %91 = vector.broadcast %cst_52 : f32 to vector<2x32xf32>
    %92 = arith.addf %91, %90 : vector<2x32xf32>
    %93 = tpu.reciprocal %92 {approx = true} : vector<2x32xf32> -> vector<2x32xf32>
    %94 = vector.extract_strided_slice %21 {offsets = [2, 0], sizes = [2, 32], strides = [1, 1]} : vector<16x32xf32> to vector<2x32xf32>
    %95 = arith.mulf %85, %77 : vector<2x32xf32>
    %96 = arith.addf %94, %95 : vector<2x32xf32>
    %97 = math.tanh %96 : vector<2x32xf32>
    %cst_53 = arith.constant 1.000000e+00 : f32
    %98 = vector.broadcast %cst_53 : f32 to vector<2x32xf32>
    %99 = arith.subf %98, %93 : vector<2x32xf32>
    %100 = arith.mulf %99, %97 : vector<2x32xf32>
    %101 = arith.mulf %93, %68 : vector<2x32xf32>
    %102 = arith.addf %100, %101 : vector<2x32xf32>
    %cst_54 = arith.constant dense<0.000000e+00> : vector<2x32xf32>
    %103 = tpu.matmul %102, %23, %cst_54 {dimension_numbers = #tpu.dot_dimension_numbers<[1], [0], [0], [1], [0, 0, 1, 1], [], []>} : vector<2x32xf32>, vector<32x32xf32>, vector<2x32xf32> -> vector<2x32xf32>
    %104 = vector.broadcast %29 : vector<1x32xf32> to vector<2x32xf32>
    %105 = arith.addf %103, %104 : vector<2x32xf32>
    %cst_55 = arith.constant dense<0.000000e+00> : vector<2x32xf32>
    %106 = tpu.matmul %102, %25, %cst_55 {dimension_numbers = #tpu.dot_dimension_numbers<[1], [0], [0], [1], [0, 0, 1, 1], [], []>} : vector<2x32xf32>, vector<32x32xf32>, vector<2x32xf32> -> vector<2x32xf32>
    %107 = vector.broadcast %31 : vector<1x32xf32> to vector<2x32xf32>
    %108 = arith.addf %106, %107 : vector<2x32xf32>
    %cst_56 = arith.constant dense<0.000000e+00> : vector<2x32xf32>
    %109 = tpu.matmul %102, %27, %cst_56 {dimension_numbers = #tpu.dot_dimension_numbers<[1], [0], [0], [1], [0, 0, 1, 1], [], []>} : vector<2x32xf32>, vector<32x32xf32>, vector<2x32xf32> -> vector<2x32xf32>
    %110 = vector.broadcast %33 : vector<1x32xf32> to vector<2x32xf32>
    %111 = arith.addf %109, %110 : vector<2x32xf32>
    %112 = vector.extract_strided_slice %7 {offsets = [4, 0], sizes = [2, 32], strides = [1, 1]} : vector<16x32xf32> to vector<2x32xf32>
    %113 = arith.addf %112, %105 : vector<2x32xf32>
    %cst_57 = arith.constant 0.000000e+00 : f32
    %114 = vector.broadcast %cst_57 : f32 to vector<2x32xf32>
    %115 = arith.subf %114, %113 : vector<2x32xf32>
    %116 = math.exp %115 : vector<2x32xf32>
    %cst_58 = arith.constant 1.000000e+00 : f32
    %117 = vector.broadcast %cst_58 : f32 to vector<2x32xf32>
    %118 = arith.addf %117, %116 : vector<2x32xf32>
    %119 = tpu.reciprocal %118 {approx = true} : vector<2x32xf32> -> vector<2x32xf32>
    %120 = vector.extract_strided_slice %14 {offsets = [4, 0], sizes = [2, 32], strides = [1, 1]} : vector<16x32xf32> to vector<2x32xf32>
    %121 = arith.addf %120, %108 : vector<2x32xf32>
    %cst_59 = arith.constant 0.000000e+00 : f32
    %122 = vector.broadcast %cst_59 : f32 to vector<2x32xf32>
    %123 = arith.subf %122, %121 : vector<2x32xf32>
    %124 = math.exp %123 : vector<2x32xf32>
    %cst_60 = arith.constant 1.000000e+00 : f32
    %125 = vector.broadcast %cst_60 : f32 to vector<2x32xf32>
    %126 = arith.addf %125, %124 : vector<2x32xf32>
    %127 = tpu.reciprocal %126 {approx = true} : vector<2x32xf32> -> vector<2x32xf32>
    %128 = vector.extract_strided_slice %21 {offsets = [4, 0], sizes = [2, 32], strides = [1, 1]} : vector<16x32xf32> to vector<2x32xf32>
    %129 = arith.mulf %119, %111 : vector<2x32xf32>
    %130 = arith.addf %128, %129 : vector<2x32xf32>
    %131 = math.tanh %130 : vector<2x32xf32>
    %cst_61 = arith.constant 1.000000e+00 : f32
    %132 = vector.broadcast %cst_61 : f32 to vector<2x32xf32>
    %133 = arith.subf %132, %127 : vector<2x32xf32>
    %134 = arith.mulf %133, %131 : vector<2x32xf32>
    %135 = arith.mulf %127, %102 : vector<2x32xf32>
    %136 = arith.addf %134, %135 : vector<2x32xf32>
    %cst_62 = arith.constant dense<0.000000e+00> : vector<2x32xf32>
    %137 = tpu.matmul %136, %23, %cst_62 {dimension_numbers = #tpu.dot_dimension_numbers<[1], [0], [0], [1], [0, 0, 1, 1], [], []>} : vector<2x32xf32>, vector<32x32xf32>, vector<2x32xf32> -> vector<2x32xf32>
    %138 = vector.broadcast %29 : vector<1x32xf32> to vector<2x32xf32>
    %139 = arith.addf %137, %138 : vector<2x32xf32>
    %cst_63 = arith.constant dense<0.000000e+00> : vector<2x32xf32>
    %140 = tpu.matmul %136, %25, %cst_63 {dimension_numbers = #tpu.dot_dimension_numbers<[1], [0], [0], [1], [0, 0, 1, 1], [], []>} : vector<2x32xf32>, vector<32x32xf32>, vector<2x32xf32> -> vector<2x32xf32>
    %141 = vector.broadcast %31 : vector<1x32xf32> to vector<2x32xf32>
    %142 = arith.addf %140, %141 : vector<2x32xf32>
    %cst_64 = arith.constant dense<0.000000e+00> : vector<2x32xf32>
    %143 = tpu.matmul %136, %27, %cst_64 {dimension_numbers = #tpu.dot_dimension_numbers<[1], [0], [0], [1], [0, 0, 1, 1], [], []>} : vector<2x32xf32>, vector<32x32xf32>, vector<2x32xf32> -> vector<2x32xf32>
    %144 = vector.broadcast %33 : vector<1x32xf32> to vector<2x32xf32>
    %145 = arith.addf %143, %144 : vector<2x32xf32>
    %146 = vector.extract_strided_slice %7 {offsets = [6, 0], sizes = [2, 32], strides = [1, 1]} : vector<16x32xf32> to vector<2x32xf32>
    %147 = arith.addf %146, %139 : vector<2x32xf32>
    %cst_65 = arith.constant 0.000000e+00 : f32
    %148 = vector.broadcast %cst_65 : f32 to vector<2x32xf32>
    %149 = arith.subf %148, %147 : vector<2x32xf32>
    %150 = math.exp %149 : vector<2x32xf32>
    %cst_66 = arith.constant 1.000000e+00 : f32
    %151 = vector.broadcast %cst_66 : f32 to vector<2x32xf32>
    %152 = arith.addf %151, %150 : vector<2x32xf32>
    %153 = tpu.reciprocal %152 {approx = true} : vector<2x32xf32> -> vector<2x32xf32>
    %154 = vector.extract_strided_slice %14 {offsets = [6, 0], sizes = [2, 32], strides = [1, 1]} : vector<16x32xf32> to vector<2x32xf32>
    %155 = arith.addf %154, %142 : vector<2x32xf32>
    %cst_67 = arith.constant 0.000000e+00 : f32
    %156 = vector.broadcast %cst_67 : f32 to vector<2x32xf32>
    %157 = arith.subf %156, %155 : vector<2x32xf32>
    %158 = math.exp %157 : vector<2x32xf32>
    %cst_68 = arith.constant 1.000000e+00 : f32
    %159 = vector.broadcast %cst_68 : f32 to vector<2x32xf32>
    %160 = arith.addf %159, %158 : vector<2x32xf32>
    %161 = tpu.reciprocal %160 {approx = true} : vector<2x32xf32> -> vector<2x32xf32>
    %162 = vector.extract_strided_slice %21 {offsets = [6, 0], sizes = [2, 32], strides = [1, 1]} : vector<16x32xf32> to vector<2x32xf32>
    %163 = arith.mulf %153, %145 : vector<2x32xf32>
    %164 = arith.addf %162, %163 : vector<2x32xf32>
    %165 = math.tanh %164 : vector<2x32xf32>
    %cst_69 = arith.constant 1.000000e+00 : f32
    %166 = vector.broadcast %cst_69 : f32 to vector<2x32xf32>
    %167 = arith.subf %166, %161 : vector<2x32xf32>
    %168 = arith.mulf %167, %165 : vector<2x32xf32>
    %169 = arith.mulf %161, %136 : vector<2x32xf32>
    %170 = arith.addf %168, %169 : vector<2x32xf32>
    %cst_70 = arith.constant dense<0.000000e+00> : vector<2x32xf32>
    %171 = tpu.matmul %170, %23, %cst_70 {dimension_numbers = #tpu.dot_dimension_numbers<[1], [0], [0], [1], [0, 0, 1, 1], [], []>} : vector<2x32xf32>, vector<32x32xf32>, vector<2x32xf32> -> vector<2x32xf32>
    %172 = vector.broadcast %29 : vector<1x32xf32> to vector<2x32xf32>
    %173 = arith.addf %171, %172 : vector<2x32xf32>
    %cst_71 = arith.constant dense<0.000000e+00> : vector<2x32xf32>
    %174 = tpu.matmul %170, %25, %cst_71 {dimension_numbers = #tpu.dot_dimension_numbers<[1], [0], [0], [1], [0, 0, 1, 1], [], []>} : vector<2x32xf32>, vector<32x32xf32>, vector<2x32xf32> -> vector<2x32xf32>
    %175 = vector.broadcast %31 : vector<1x32xf32> to vector<2x32xf32>
    %176 = arith.addf %174, %175 : vector<2x32xf32>
    %cst_72 = arith.constant dense<0.000000e+00> : vector<2x32xf32>
    %177 = tpu.matmul %170, %27, %cst_72 {dimension_numbers = #tpu.dot_dimension_numbers<[1], [0], [0], [1], [0, 0, 1, 1], [], []>} : vector<2x32xf32>, vector<32x32xf32>, vector<2x32xf32> -> vector<2x32xf32>
    %178 = vector.broadcast %33 : vector<1x32xf32> to vector<2x32xf32>
    %179 = arith.addf %177, %178 : vector<2x32xf32>
    %180 = vector.extract_strided_slice %7 {offsets = [8, 0], sizes = [2, 32], strides = [1, 1]} : vector<16x32xf32> to vector<2x32xf32>
    %181 = arith.addf %180, %173 : vector<2x32xf32>
    %cst_73 = arith.constant 0.000000e+00 : f32
    %182 = vector.broadcast %cst_73 : f32 to vector<2x32xf32>
    %183 = arith.subf %182, %181 : vector<2x32xf32>
    %184 = math.exp %183 : vector<2x32xf32>
    %cst_74 = arith.constant 1.000000e+00 : f32
    %185 = vector.broadcast %cst_74 : f32 to vector<2x32xf32>
    %186 = arith.addf %185, %184 : vector<2x32xf32>
    %187 = tpu.reciprocal %186 {approx = true} : vector<2x32xf32> -> vector<2x32xf32>
    %188 = vector.extract_strided_slice %14 {offsets = [8, 0], sizes = [2, 32], strides = [1, 1]} : vector<16x32xf32> to vector<2x32xf32>
    %189 = arith.addf %188, %176 : vector<2x32xf32>
    %cst_75 = arith.constant 0.000000e+00 : f32
    %190 = vector.broadcast %cst_75 : f32 to vector<2x32xf32>
    %191 = arith.subf %190, %189 : vector<2x32xf32>
    %192 = math.exp %191 : vector<2x32xf32>
    %cst_76 = arith.constant 1.000000e+00 : f32
    %193 = vector.broadcast %cst_76 : f32 to vector<2x32xf32>
    %194 = arith.addf %193, %192 : vector<2x32xf32>
    %195 = tpu.reciprocal %194 {approx = true} : vector<2x32xf32> -> vector<2x32xf32>
    %196 = vector.extract_strided_slice %21 {offsets = [8, 0], sizes = [2, 32], strides = [1, 1]} : vector<16x32xf32> to vector<2x32xf32>
    %197 = arith.mulf %187, %179 : vector<2x32xf32>
    %198 = arith.addf %196, %197 : vector<2x32xf32>
    %199 = math.tanh %198 : vector<2x32xf32>
    %cst_77 = arith.constant 1.000000e+00 : f32
    %200 = vector.broadcast %cst_77 : f32 to vector<2x32xf32>
    %201 = arith.subf %200, %195 : vector<2x32xf32>
    %202 = arith.mulf %201, %199 : vector<2x32xf32>
    %203 = arith.mulf %195, %170 : vector<2x32xf32>
    %204 = arith.addf %202, %203 : vector<2x32xf32>
    %cst_78 = arith.constant dense<0.000000e+00> : vector<2x32xf32>
    %205 = tpu.matmul %204, %23, %cst_78 {dimension_numbers = #tpu.dot_dimension_numbers<[1], [0], [0], [1], [0, 0, 1, 1], [], []>} : vector<2x32xf32>, vector<32x32xf32>, vector<2x32xf32> -> vector<2x32xf32>
    %206 = vector.broadcast %29 : vector<1x32xf32> to vector<2x32xf32>
    %207 = arith.addf %205, %206 : vector<2x32xf32>
    %cst_79 = arith.constant dense<0.000000e+00> : vector<2x32xf32>
    %208 = tpu.matmul %204, %25, %cst_79 {dimension_numbers = #tpu.dot_dimension_numbers<[1], [0], [0], [1], [0, 0, 1, 1], [], []>} : vector<2x32xf32>, vector<32x32xf32>, vector<2x32xf32> -> vector<2x32xf32>
    %209 = vector.broadcast %31 : vector<1x32xf32> to vector<2x32xf32>
    %210 = arith.addf %208, %209 : vector<2x32xf32>
    %cst_80 = arith.constant dense<0.000000e+00> : vector<2x32xf32>
    %211 = tpu.matmul %204, %27, %cst_80 {dimension_numbers = #tpu.dot_dimension_numbers<[1], [0], [0], [1], [0, 0, 1, 1], [], []>} : vector<2x32xf32>, vector<32x32xf32>, vector<2x32xf32> -> vector<2x32xf32>
    %212 = vector.broadcast %33 : vector<1x32xf32> to vector<2x32xf32>
    %213 = arith.addf %211, %212 : vector<2x32xf32>
    %214 = vector.extract_strided_slice %7 {offsets = [10, 0], sizes = [2, 32], strides = [1, 1]} : vector<16x32xf32> to vector<2x32xf32>
    %215 = arith.addf %214, %207 : vector<2x32xf32>
    %cst_81 = arith.constant 0.000000e+00 : f32
    %216 = vector.broadcast %cst_81 : f32 to vector<2x32xf32>
    %217 = arith.subf %216, %215 : vector<2x32xf32>
    %218 = math.exp %217 : vector<2x32xf32>
    %cst_82 = arith.constant 1.000000e+00 : f32
    %219 = vector.broadcast %cst_82 : f32 to vector<2x32xf32>
    %220 = arith.addf %219, %218 : vector<2x32xf32>
    %221 = tpu.reciprocal %220 {approx = true} : vector<2x32xf32> -> vector<2x32xf32>
    %222 = vector.extract_strided_slice %14 {offsets = [10, 0], sizes = [2, 32], strides = [1, 1]} : vector<16x32xf32> to vector<2x32xf32>
    %223 = arith.addf %222, %210 : vector<2x32xf32>
    %cst_83 = arith.constant 0.000000e+00 : f32
    %224 = vector.broadcast %cst_83 : f32 to vector<2x32xf32>
    %225 = arith.subf %224, %223 : vector<2x32xf32>
    %226 = math.exp %225 : vector<2x32xf32>
    %cst_84 = arith.constant 1.000000e+00 : f32
    %227 = vector.broadcast %cst_84 : f32 to vector<2x32xf32>
    %228 = arith.addf %227, %226 : vector<2x32xf32>
    %229 = tpu.reciprocal %228 {approx = true} : vector<2x32xf32> -> vector<2x32xf32>
    %230 = vector.extract_strided_slice %21 {offsets = [10, 0], sizes = [2, 32], strides = [1, 1]} : vector<16x32xf32> to vector<2x32xf32>
    %231 = arith.mulf %221, %213 : vector<2x32xf32>
    %232 = arith.addf %230, %231 : vector<2x32xf32>
    %233 = math.tanh %232 : vector<2x32xf32>
    %cst_85 = arith.constant 1.000000e+00 : f32
    %234 = vector.broadcast %cst_85 : f32 to vector<2x32xf32>
    %235 = arith.subf %234, %229 : vector<2x32xf32>
    %236 = arith.mulf %235, %233 : vector<2x32xf32>
    %237 = arith.mulf %229, %204 : vector<2x32xf32>
    %238 = arith.addf %236, %237 : vector<2x32xf32>
    %cst_86 = arith.constant dense<0.000000e+00> : vector<2x32xf32>
    %239 = tpu.matmul %238, %23, %cst_86 {dimension_numbers = #tpu.dot_dimension_numbers<[1], [0], [0], [1], [0, 0, 1, 1], [], []>} : vector<2x32xf32>, vector<32x32xf32>, vector<2x32xf32> -> vector<2x32xf32>
    %240 = vector.broadcast %29 : vector<1x32xf32> to vector<2x32xf32>
    %241 = arith.addf %239, %240 : vector<2x32xf32>
    %cst_87 = arith.constant dense<0.000000e+00> : vector<2x32xf32>
    %242 = tpu.matmul %238, %25, %cst_87 {dimension_numbers = #tpu.dot_dimension_numbers<[1], [0], [0], [1], [0, 0, 1, 1], [], []>} : vector<2x32xf32>, vector<32x32xf32>, vector<2x32xf32> -> vector<2x32xf32>
    %243 = vector.broadcast %31 : vector<1x32xf32> to vector<2x32xf32>
    %244 = arith.addf %242, %243 : vector<2x32xf32>
    %cst_88 = arith.constant dense<0.000000e+00> : vector<2x32xf32>
    %245 = tpu.matmul %238, %27, %cst_88 {dimension_numbers = #tpu.dot_dimension_numbers<[1], [0], [0], [1], [0, 0, 1, 1], [], []>} : vector<2x32xf32>, vector<32x32xf32>, vector<2x32xf32> -> vector<2x32xf32>
    %246 = vector.broadcast %33 : vector<1x32xf32> to vector<2x32xf32>
    %247 = arith.addf %245, %246 : vector<2x32xf32>
    %248 = vector.extract_strided_slice %7 {offsets = [12, 0], sizes = [2, 32], strides = [1, 1]} : vector<16x32xf32> to vector<2x32xf32>
    %249 = arith.addf %248, %241 : vector<2x32xf32>
    %cst_89 = arith.constant 0.000000e+00 : f32
    %250 = vector.broadcast %cst_89 : f32 to vector<2x32xf32>
    %251 = arith.subf %250, %249 : vector<2x32xf32>
    %252 = math.exp %251 : vector<2x32xf32>
    %cst_90 = arith.constant 1.000000e+00 : f32
    %253 = vector.broadcast %cst_90 : f32 to vector<2x32xf32>
    %254 = arith.addf %253, %252 : vector<2x32xf32>
    %255 = tpu.reciprocal %254 {approx = true} : vector<2x32xf32> -> vector<2x32xf32>
    %256 = vector.extract_strided_slice %14 {offsets = [12, 0], sizes = [2, 32], strides = [1, 1]} : vector<16x32xf32> to vector<2x32xf32>
    %257 = arith.addf %256, %244 : vector<2x32xf32>
    %cst_91 = arith.constant 0.000000e+00 : f32
    %258 = vector.broadcast %cst_91 : f32 to vector<2x32xf32>
    %259 = arith.subf %258, %257 : vector<2x32xf32>
    %260 = math.exp %259 : vector<2x32xf32>
    %cst_92 = arith.constant 1.000000e+00 : f32
    %261 = vector.broadcast %cst_92 : f32 to vector<2x32xf32>
    %262 = arith.addf %261, %260 : vector<2x32xf32>
    %263 = tpu.reciprocal %262 {approx = true} : vector<2x32xf32> -> vector<2x32xf32>
    %264 = vector.extract_strided_slice %21 {offsets = [12, 0], sizes = [2, 32], strides = [1, 1]} : vector<16x32xf32> to vector<2x32xf32>
    %265 = arith.mulf %255, %247 : vector<2x32xf32>
    %266 = arith.addf %264, %265 : vector<2x32xf32>
    %267 = math.tanh %266 : vector<2x32xf32>
    %cst_93 = arith.constant 1.000000e+00 : f32
    %268 = vector.broadcast %cst_93 : f32 to vector<2x32xf32>
    %269 = arith.subf %268, %263 : vector<2x32xf32>
    %270 = arith.mulf %269, %267 : vector<2x32xf32>
    %271 = arith.mulf %263, %238 : vector<2x32xf32>
    %272 = arith.addf %270, %271 : vector<2x32xf32>
    %cst_94 = arith.constant dense<0.000000e+00> : vector<2x32xf32>
    %273 = tpu.matmul %272, %23, %cst_94 {dimension_numbers = #tpu.dot_dimension_numbers<[1], [0], [0], [1], [0, 0, 1, 1], [], []>} : vector<2x32xf32>, vector<32x32xf32>, vector<2x32xf32> -> vector<2x32xf32>
    %274 = vector.broadcast %29 : vector<1x32xf32> to vector<2x32xf32>
    %275 = arith.addf %273, %274 : vector<2x32xf32>
    %cst_95 = arith.constant dense<0.000000e+00> : vector<2x32xf32>
    %276 = tpu.matmul %272, %25, %cst_95 {dimension_numbers = #tpu.dot_dimension_numbers<[1], [0], [0], [1], [0, 0, 1, 1], [], []>} : vector<2x32xf32>, vector<32x32xf32>, vector<2x32xf32> -> vector<2x32xf32>
    %277 = vector.broadcast %31 : vector<1x32xf32> to vector<2x32xf32>
    %278 = arith.addf %276, %277 : vector<2x32xf32>
    %cst_96 = arith.constant dense<0.000000e+00> : vector<2x32xf32>
    %279 = tpu.matmul %272, %27, %cst_96 {dimension_numbers = #tpu.dot_dimension_numbers<[1], [0], [0], [1], [0, 0, 1, 1], [], []>} : vector<2x32xf32>, vector<32x32xf32>, vector<2x32xf32> -> vector<2x32xf32>
    %280 = vector.broadcast %33 : vector<1x32xf32> to vector<2x32xf32>
    %281 = arith.addf %279, %280 : vector<2x32xf32>
    %282 = vector.extract_strided_slice %7 {offsets = [14, 0], sizes = [2, 32], strides = [1, 1]} : vector<16x32xf32> to vector<2x32xf32>
    %283 = arith.addf %282, %275 : vector<2x32xf32>
    %cst_97 = arith.constant 0.000000e+00 : f32
    %284 = vector.broadcast %cst_97 : f32 to vector<2x32xf32>
    %285 = arith.subf %284, %283 : vector<2x32xf32>
    %286 = math.exp %285 : vector<2x32xf32>
    %cst_98 = arith.constant 1.000000e+00 : f32
    %287 = vector.broadcast %cst_98 : f32 to vector<2x32xf32>
    %288 = arith.addf %287, %286 : vector<2x32xf32>
    %289 = tpu.reciprocal %288 {approx = true} : vector<2x32xf32> -> vector<2x32xf32>
    %290 = vector.extract_strided_slice %14 {offsets = [14, 0], sizes = [2, 32], strides = [1, 1]} : vector<16x32xf32> to vector<2x32xf32>
    %291 = arith.addf %290, %278 : vector<2x32xf32>
    %cst_99 = arith.constant 0.000000e+00 : f32
    %292 = vector.broadcast %cst_99 : f32 to vector<2x32xf32>
    %293 = arith.subf %292, %291 : vector<2x32xf32>
    %294 = math.exp %293 : vector<2x32xf32>
    %cst_100 = arith.constant 1.000000e+00 : f32
    %295 = vector.broadcast %cst_100 : f32 to vector<2x32xf32>
    %296 = arith.addf %295, %294 : vector<2x32xf32>
    %297 = tpu.reciprocal %296 {approx = true} : vector<2x32xf32> -> vector<2x32xf32>
    %298 = vector.extract_strided_slice %21 {offsets = [14, 0], sizes = [2, 32], strides = [1, 1]} : vector<16x32xf32> to vector<2x32xf32>
    %299 = arith.mulf %289, %281 : vector<2x32xf32>
    %300 = arith.addf %298, %299 : vector<2x32xf32>
    %301 = math.tanh %300 : vector<2x32xf32>
    %cst_101 = arith.constant 1.000000e+00 : f32
    %302 = vector.broadcast %cst_101 : f32 to vector<2x32xf32>
    %303 = arith.subf %302, %297 : vector<2x32xf32>
    %304 = arith.mulf %303, %301 : vector<2x32xf32>
    %305 = arith.mulf %297, %272 : vector<2x32xf32>
    %306 = arith.addf %304, %305 : vector<2x32xf32>
    %cst_102 = arith.constant 0.000000e+00 : f32
    %307 = vector.broadcast %cst_102 : f32 to vector<2x32xf32>
    %308 = arith.maximumf %306, %307 : vector<2x32xf32>
    %c0_103 = arith.constant 0 : index
    %c0_104 = arith.constant 0 : index
    %309 = vector.load %arg5[%c0_103, %c0_104] : memref<32x8xf32, #tpu.memory_space<vmem>>, vector<32x8xf32>
    %cst_105 = arith.constant dense<0.000000e+00> : vector<2x8xf32>
    %310 = tpu.matmul %308, %309, %cst_105 {dimension_numbers = #tpu.dot_dimension_numbers<[1], [0], [0], [1], [0, 0, 1, 1], [], []>} : vector<2x32xf32>, vector<32x8xf32>, vector<2x8xf32> -> vector<2x8xf32>
    %c0_106 = arith.constant 0 : index
    %c0_107 = arith.constant 0 : index
    %311 = vector.load %arg6[%c0_106, %c0_107] : memref<1x8xf32, #tpu.memory_space<vmem>>, vector<1x8xf32>
    %312 = vector.broadcast %311 : vector<1x8xf32> to vector<2x8xf32>
    %313 = arith.addf %310, %312 : vector<2x8xf32>
    %c0_108 = arith.constant 0 : index
    %c0_109 = arith.constant 0 : index
    %314 = vector.load %arg7[%c0_108, %c0_109] : memref<2x8xf32, #tpu.memory_space<vmem>>, vector<2x8xf32>
    tpu.vector_store %arg7[%c0_108, %c0_109], %313 {strides = array<i32>} : memref<2x8xf32, #tpu.memory_space<vmem>>, vector<2x8xf32>,
    return
  }
}

</mosaic_0001>

<bundles_post_ra>
// kernel: gru_model_forward.1
= control target key start
LH: loop header
LB: loop body
LE: loop exit
PB: predicated region body
PF: predicated region fallthrough
CT: control target
= control target key end

     0   :  { %vm35_vm0 = vcmask 130048   ;;  %v1094_v16 = vmov 0.0   ;;  %s1460_s0 = inlined_call_operand.vmem [shape: f32[16,16], index: 0, kind: input, shape index: {}]   ;;  %s1461_s1 = inlined_call_operand.vmem [shape: f32[3,16,32], index: 1, kind: input, shape index: {}]   ;;  %s1462_s2 = inlined_call_operand.vmem [shape: f32[3,32,32], index: 2, kind: input, shape index: {}]   ;;  %s1463_s3 = inlined_call_operand.vmem [shape: f32[3,1,32], index: 3, kind: input, shape index: {}]   ;;  %s1464_s4 = inlined_call_operand.vmem [shape: f32[3,1,32], index: 4, kind: input, shape index: {}]   ;;  %s1465_s5 = inlined_call_operand.vmem [shape: f32[32,8], index: 5, kind: input, shape index: {}]   ;;  %s1466_s6 = inlined_call_operand.vmem [shape: f32[1,8], index: 6, kind: input, shape index: {}]   ;;  %s1467_s7 = inlined_call_operand.hbm [shape: f32[2,8], index: 7, kind: output, shape index: {}]  }
   0x1   :  { %v1139_v0 = vld [vmem:[%s1462_s2 + $0x18] sm:$0xff]  ;;  %v1144_v1 = vld [vmem:[%s1462_s2 + $0x10] sm:$0xff]  ;;  %v30_v2 = vld [vmem:[%s1461_s1 + $0x8] sm:$0xff] }
   0x2   :  { %165 = vmatpush.msra.mxu3 %v1139_v0  ;;  %v1153_v3 = vld [vmem:[%s1462_s2 + $0x8] sm:$0xff]  ;;  %56 = vmatpush.msra.mxu0 %v30_v2  ;;  %v29_v4 = vld [vmem:[%s1461_s1] sm:$0xff]  ;;  %v938_v6 = vld [vmem:[%s1461_s1 + $0x18] sm:$0xff] }
   0x3   :  { %v27_v5 = vld [vmem:[%s1460_s0] sm:$0xff]  ;;  %87 = vmatpush.msra.mxu1 %v938_v6  ;;  %v1173_v8 = vld [vmem:[%s1462_s2 + $0x58] sm:$0xff]  ;;  %v937_v9 = vld [vmem:[%s1461_s1 + $0x10] sm:$0xff] }
   0x4   :  { %166 = vmatpush.msra.mxu3 %v1144_v1  ;;  %v1168_v7 = vld [vmem:[%s1462_s2] sm:$0xff]  ;;  %57 = vmatpush.msra.mxu0 %v29_v4  ;;  %v1182_v10 = vld [vmem:[%s1462_s2 + $0x38] sm:$0xff]  ;;  %v1188_v11 = vld [vmem:[%s1462_s2 + $0x50] sm:$0xff] }
   0x5   :  { %935 = vmatmul.msk.f32.vlgmr.msra.gmra.mxu0 %vm35_vm0, %v27_v5  ;;  %v1193_v12 = vld [vmem:[%s1462_s2 + $0x30] sm:$0xff]  ;;  %88 = vmatpush.msra.mxu1 %v937_v9  ;;  %v1199_v13 = vld [vmem:[%s1462_s2 + $0x48] sm:$0xff]  ;;  %v942_v15 = vld [vmem:[%s1461_s1 + $0x20] sm:$0xff] }
   0x6   :  { %167 = vmatpush.msra.mxu3 %v1153_v3  ;;  %211 = vmatpush.msrb.mxu0 %v1173_v8  ;;  %v943_v14 = vld [vmem:[%s1461_s1 + $0x28] sm:$0xff]  ;;  %v1214_v17 = vld [vmem:[%s1462_s2 + $0x40] sm:$0xff] }
   0x7   :  { %940 = vmatmul.msk.f32.vlgmr.msra.gmra.mxu1 %vm35_vm0, %v27_v5  ;;  %118 = vmatpush.msra.mxu2 %v943_v14 }
   0x8   :  { %168 = vmatpush.msra.mxu3 %v1168_v7  ;;  %212 = vmatpush.msrb.mxu0 %v1188_v11 }
   0x9   :  { %169 = vmatmul.f32.vlgmr.msra.gmra.mxu3 %v1094_v16 }
   0xa   :  { %188 = vmatpush.msrb.mxu3 %v1182_v10 }
   0xb   :  { %12 = vsyncpa [#allocation3], 0  ;;  %v1219_v18 = vld [vmem:[%s1462_s2 + $0x28] sm:$0xff]  ;;  %213 = vmatpush.msrb.mxu0 %v1199_v13  ;;  %253 = vmatpush.msrb.mxu1 %v1139_v0  ;;  %v1230_v20 = vld [vmem:[%s1462_s2 + $0x20] sm:$0xff]  ;;  %vm149_vm1 = vcmask 261120   ;;  %s1095_s11 = smov [#allocation2]  }
   0xc   :  { %v28_v19 = vld [vmem:[%s1460_s0 + $0x8] sm:$0xff]  ;;  %189 = vmatpush.msrb.mxu3 %v1193_v12  ;;  %119 = vmatpush.msra.mxu2 %v942_v15  ;;  %v981_v22 = vld [vmem:[%s1463_s3] ss:$0 sm:$0xff]  ;;  %v1287_v30 = vld [vmem:[%s1463_s3 + $0x1] ss:$0 sm:$0xff]  ;;  %s924_s12 = sshll.u32 %s1095_s11, 4  ;;  %s925_s12 = int_to_ptr.vmem [resolvable:$true] %s924_s12 }
   0xd   :  { %945 = vmatmul.msk.f32.vlgmr.msra.gmra.mxu2 %vm35_vm0, %v27_v5  ;;  %214 = vmatpush.msrb.mxu0 %v1214_v17  ;;  %v1276_v23 = vld [vmem:[%s1464_s4] ss:$0 sm:$0xff]  ;;  %v1292_v33 = vld [vmem:[%s1464_s4 + $0x1] ss:$0 sm:$0xff]  ;;  %v1302_v43 = vld [vmem:[%s1464_s4 + $0x2] ss:$0 sm:$0xff] }
   0xe   :  { %190 = vmatpush.msrb.mxu3 %v1219_v18  ;;  %936 = vmatmul.msk.f32.gmra.mxu0 %vm35_vm0, %v28_v19  ;;  %v1307_v45 = vld [vmem:[%s1463_s3 + $0x2] ss:$0 sm:$0xff]  ;;  %s926_s1 = sshll.u32 %s1467_s7, 4  ;;  %vm917_vm2 = vcmask 58368   ;;  %s927_s1 = int_to_ptr.hbm [resolvable:$true] %s926_s1 }
   0xf   :  { %273 = vmatpush.msrb.mxu2 %v1182_v10  ;;  %254 = vmatpush.msrb.mxu1 %v1144_v1 }
  0x10   :  { %191 = vmatpush.msrb.mxu3 %v1230_v20  ;;  %941 = vmatmul.msk.f32.gmra.mxu1 %vm35_vm0, %v28_v19 }
  0x11   :  { %192 = vmatmul.f32.vlgmr.msrb.gmra.mxu3 %v1094_v16  ;;  %274 = vmatpush.msrb.mxu2 %v1193_v12 }
  0x12   :  { %255 = vmatpush.msrb.mxu1 %v1153_v3  ;;  %293 = vmatpush.msra.mxu3 %v1173_v8 }
  0x13   :  { %275 = vmatpush.msrb.mxu2 %v1219_v18  ;;  %347 = vmatpush.msra.mxu0 %v1139_v0 }
  0x14   :  { %294 = vmatpush.msra.mxu3 %v1188_v11  ;;  %256 = vmatpush.msrb.mxu1 %v1168_v7 }
  0x15   :  { %946 = vmatmul.msk.f32.gmra.mxu2 %vm35_vm0, %v28_v19  ;;  %348 = vmatpush.msra.mxu0 %v1144_v1 }
  0x16   :  { %367 = vmatpush.msra.mxu1 %v1182_v10  ;;  %215 = vmatmul.f32.vlgmr.msrb.gmra.mxu0 %v1094_v16 }
  0x17   :  { %295 = vmatpush.msra.mxu3 %v1199_v13  ;;  %276 = vmatpush.msrb.mxu2 %v1230_v20 }
  0x18   :  { %368 = vmatpush.msra.mxu1 %v1193_v12  ;;  %349 = vmatpush.msra.mxu0 %v1153_v3 }
  0x19   :  { %296 = vmatpush.msra.mxu3 %v1214_v17  ;;  %387 = vmatpush.msra.mxu2 %v1173_v8 }
  0x1a   :  { %369 = vmatpush.msra.mxu1 %v1219_v18  ;;  %350 = vmatpush.msra.mxu0 %v1168_v7 }
  0x1b   :  { %388 = vmatpush.msra.mxu2 %v1188_v11  ;;  %441 = vmatpush.msrb.mxu3 %v1139_v0 }
  0x1c   :  { %461 = vmatpush.msrb.mxu0 %v1182_v10  ;;  %370 = vmatpush.msra.mxu1 %v1230_v20 }
  0x1d   :  { %389 = vmatpush.msra.mxu2 %v1199_v13  ;;  %442 = vmatpush.msrb.mxu3 %v1144_v1 }
  0x1e   :  { %462 = vmatpush.msrb.mxu0 %v1193_v12 }
  0x1f   :  { %390 = vmatpush.msra.mxu2 %v1214_v17  ;;  %443 = vmatpush.msrb.mxu3 %v1153_v3 }
  0x20   :  { %463 = vmatpush.msrb.mxu0 %v1219_v18 }
  0x21   :  { %444 = vmatpush.msrb.mxu3 %v1168_v7 }
  0x22   :  { %464 = vmatpush.msrb.mxu0 %v1230_v20 }
  0x82   :  { %v59_v21 = vpop.f32.mrf.mxu0 }
  0x83   :  { %v1278_v24 = vadd.f32 %v981_v22, %v59_v21 }
  0x84   :  { %v90_v31 = vpop.f32.mrf.mxu1 }
  0x85   :  { %v1295_v35 = vadd.f32 %v1287_v30, %v90_v31 }
  0x8b   :  { %v62_v25 = vpop.f32.mrf.mxu0 }
  0x8c   :  { %v170_v26 = vpop.f32.mrf.mxu3  ;;  %v1280_v27 = vadd.f32 %v981_v22, %v62_v25 }
  0x8d   :  { %v171_v28 = vadd.f32 %v1276_v23, %v170_v26  ;;  %v1329_v60 = vpop.f32.mrf.mxu1 }
  0x8f   :  { %v219_v29 = vadd.f32 %v171_v28, %v1278_v24 }
  0x90   :  { %v121_v46 = vpop.f32.mrf.mxu2 }
  0x91   :  { %v220_v32 = vsub.f32 0.0, %v219_v29  ;;  %v1311_v49 = vadd.f32 %v1307_v45, %v121_v46 }
  0x93   :  { %v221_v34 = vmul.f32 1.442695, %v220_v32  ;;  %v216_v44 = vpop.f32.mrf.mxu0 }
  0x94   :  { %v193_v36 = vpop.f32.mrf.mxu3  ;;  %v217_v47 = vadd.f32 %v1302_v43, %v216_v44 }
  0x95   :  { %988 = vpow2.f32 %v221_v34  ;;  %v194_v37 = vadd.f32 %v1292_v33, %v193_v36 }
  0x97   :  { %v225_v38 = vadd.f32 %v194_v37, %v1295_v35 }
  0x98   :  { %v1331_v61 = vpop.f32.mrf.mxu2 }
  0x99   :  { %v226_v39 = vsub.f32 0.0, %v225_v38 }
  0x9b   :  { %v989_v40 = vpop.eup %988  ;;  %v227_v41 = vmul.f32 1.442695, %v226_v39 }
  0x9c   :  { %v223_v42 = vadd.f32 1.0, %v989_v40 }
  0x9d   :  { %990 = vpow2.f32 %v227_v41 }
  0x9e   :  { %992 = vrcp.f32 %v223_v42 }
  0xa3   :  { %v991_v48 = vpop.eup %990 }
  0xa4   :  { %v993_v50 = vpop.eup %992  ;;  %v229_v51 = vadd.f32 1.0, %v991_v48 }
  0xa5   :  { %v231_v52 = vmul.f32 %v993_v50, %v217_v47 }
  0xa6   :  { %994 = vrcp.f32 %v229_v51 }
  0xa7   :  { %v232_v53 = vadd.f32 %v231_v52, %v1311_v49 }
  0xa9   :  { %996 = vtanh.f32 %v232_v53 }
  0xac   :  { %v995_v54 = vpop.eup %994 }
  0xad   :  { %v234_v55 = vsub.f32 1.0, %v995_v54  ;;  %v236_v58 = vmul.f32 0.0, %v995_v54 }
  0xaf   :  { %v997_v56 = vpop.eup %996 }
  0xb0   :  { %v235_v57 = vmul.f32 %v997_v56, %v234_v55 }
  0xb2   :  { %v237_v59 = vadd.f32 %v236_v58, %v235_v57 }
  0xb4   :  { %957 = vmatmul.msk.f32.vlgmr.msrb.gmra.mxu1 %vm149_vm1, %v237_v59  ;;  %958 = vmatmul.msk.f32.vlgmr.msrb.gmra.mxu2 %vm149_vm1, %v237_v59  ;;  %v327_v39 = vrot.slane %v237_v59, 6 }
  0xb5   :  { %959 = vmatmul.msk.f32.vlgmr.msra.gmra.mxu3 %vm149_vm1, %v237_v59  ;;  %481 = vmatpush.msrb.mxu1 %v1173_v8 }
  0xb6   :  { %535 = vmatpush.msrb.mxu2 %v1139_v0  ;;  %555 = vmatpush.msra.mxu3 %v1182_v10 }
  0xb7   :  { %482 = vmatpush.msrb.mxu1 %v1188_v11 }
  0xb8   :  { %536 = vmatpush.msrb.mxu2 %v1144_v1  ;;  %556 = vmatpush.msra.mxu3 %v1193_v12 }
  0xb9   :  { %483 = vmatpush.msrb.mxu1 %v1199_v13 }
  0xba   :  { %537 = vmatpush.msrb.mxu2 %v1153_v3  ;;  %557 = vmatpush.msra.mxu3 %v1219_v18 }
  0xbb   :  { %484 = vmatpush.msrb.mxu1 %v1214_v17 }
  0xbc   :  { %538 = vmatpush.msrb.mxu2 %v1168_v7  ;;  %558 = vmatpush.msra.mxu3 %v1230_v20 }
 0x131   :  { %v258_v62 = vpop.f32.mrf.mxu1 }
 0x132   :  { %v259_v63 = vadd.f32 %v1276_v23, %v258_v62 }
 0x134   :  { %v302_v2 = vrot.slane %v259_v63, 6 }
 0x136   :  { %v304_v4 = vadd.f32 %v302_v2, %v1278_v24 }
 0x137   :  { %v278_v5 = vpop.f32.mrf.mxu2 }
 0x138   :  { %v305_v6 = vsub.f32 0.0, %v304_v4  ;;  %v279_v9 = vadd.f32 %v1292_v33, %v278_v5  ;;  %v298_v26 = vpop.f32.mrf.mxu3 }
 0x139   :  { %v299_v28 = vadd.f32 %v1302_v43, %v298_v26 }
 0x13a   :  { %v306_v14 = vmul.f32 1.442695, %v305_v6  ;;  %v311_v15 = vrot.slane %v279_v9, 6 }
 0x13b   :  { %v320_v32 = vrot.slane %v299_v28, 6 }
 0x13c   :  { %998 = vpow2.f32 %v306_v14  ;;  %v313_v16 = vadd.f32 %v311_v15, %v1295_v35 }
 0x13e   :  { %v314_v19 = vsub.f32 0.0, %v313_v16 }
 0x140   :  { %v315_v21 = vmul.f32 1.442695, %v314_v19 }
 0x142   :  { %v999_v22 = vpop.eup %998  ;;  %1000 = vpow2.f32 %v315_v21 }
 0x143   :  { %v308_v25 = vadd.f32 1.0, %v999_v22 }
 0x145   :  { %1002 = vrcp.f32 %v308_v25 }
 0x148   :  { %v1001_v29 = vpop.eup %1000 }
 0x149   :  { %v317_v31 = vadd.f32 1.0, %v1001_v29 }
 0x14b   :  { %v1003_v34 = vpop.eup %1002  ;;  %1004 = vrcp.f32 %v317_v31 }
 0x14c   :  { %v322_v36 = vmul.f32 %v1003_v34, %v320_v32 }
 0x14e   :  { %v323_v37 = vadd.f32 %v322_v36, %v1311_v49 }
 0x150   :  { %1006 = vtanh.f32 %v323_v37 }
 0x151   :  { %v1005_v38 = vpop.eup %1004 }
 0x152   :  { %v325_v40 = vsub.f32 1.0, %v1005_v38  ;;  %v329_v42 = vmul.f32 %v1005_v38, %v327_v39 }
 0x156   :  { %v1007_v41 = vpop.eup %1006 }
 0x157   :  { %v326_v44 = vmul.f32 %v1007_v41, %v325_v40 }
 0x159   :  { %v330_v46 = vadd.f32 %v329_v42, %v326_v44 }
 0x15b   :  { %v332_v47 = vrot.slane %v330_v46, 2  ;;  %v421_v25 = vrot.slane %v330_v46, 6 }
 0x15d   :  { %960 = vmatmul.msk.f32.vlgmr.msra.gmra.mxu0 %vm149_vm1, %v332_v47  ;;  %961 = vmatmul.msk.f32.vlgmr.msra.gmra.mxu1 %vm149_vm1, %v332_v47 }
 0x15e   :  { %962 = vmatmul.msk.f32.vlgmr.msra.gmra.mxu2 %vm149_vm1, %v332_v47  ;;  %575 = vmatpush.msra.mxu0 %v1173_v8 }
 0x15f   :  { %618 = vmatpush.msra.mxu1 %v1139_v0  ;;  %638 = vmatpush.msra.mxu2 %v1182_v10 }
 0x160   :  { %576 = vmatpush.msra.mxu0 %v1188_v11 }
 0x161   :  { %619 = vmatpush.msra.mxu1 %v1144_v1  ;;  %639 = vmatpush.msra.mxu2 %v1193_v12 }
 0x162   :  { %577 = vmatpush.msra.mxu0 %v1199_v13 }
 0x163   :  { %620 = vmatpush.msra.mxu1 %v1153_v3  ;;  %640 = vmatpush.msra.mxu2 %v1219_v18 }
 0x164   :  { %578 = vmatpush.msra.mxu0 %v1214_v17 }
 0x165   :  { %621 = vmatpush.msra.mxu1 %v1168_v7  ;;  %641 = vmatpush.msra.mxu2 %v1230_v20 }
 0x1da   :  { %v352_v48 = vpop.f32.mrf.mxu0  ;;  %v372_v50 = vpop.f32.mrf.mxu1 }
 0x1db   :  { %v353_v51 = vadd.f32 %v1276_v23, %v352_v48  ;;  %v373_v52 = vadd.f32 %v1292_v33, %v372_v50 }
 0x1dd   :  { %v396_v53 = vrot.slane %v353_v51, 4  ;;  %v405_v54 = vrot.slane %v373_v52, 4 }
 0x1df   :  { %v398_v55 = vadd.f32 %v396_v53, %v1278_v24  ;;  %v407_v56 = vadd.f32 %v405_v54, %v1295_v35 }
 0x1e1   :  { %v399_v57 = vsub.f32 0.0, %v398_v55  ;;  %v408_v58 = vsub.f32 0.0, %v407_v56  ;;  %v392_v4 = vpop.f32.mrf.mxu2 }
 0x1e2   :  { %v393_v6 = vadd.f32 %v1302_v43, %v392_v4 }
 0x1e3   :  { %v400_v59 = vmul.f32 1.442695, %v399_v57  ;;  %v409_v62 = vmul.f32 1.442695, %v408_v58 }
 0x1e4   :  { %v414_v14 = vrot.slane %v393_v6, 4 }
 0x1e5   :  { %1008 = vpow2.f32 %v400_v59 }
 0x1e6   :  { %1010 = vpow2.f32 %v409_v62 }
 0x1eb   :  { %v1009_v63 = vpop.eup %1008 }
 0x1ec   :  { %v402_v2 = vadd.f32 1.0, %v1009_v63  ;;  %v1011_v5 = vpop.eup %1010 }
 0x1ed   :  { %v411_v9 = vadd.f32 1.0, %v1011_v5 }
 0x1ee   :  { %1012 = vrcp.f32 %v402_v2 }
 0x1ef   :  { %1014 = vrcp.f32 %v411_v9 }
 0x1f4   :  { %v1013_v15 = vpop.eup %1012 }
 0x1f5   :  { %v416_v16 = vmul.f32 %v1013_v15, %v414_v14  ;;  %v1015_v21 = vpop.eup %1014 }
 0x1f6   :  { %v419_v22 = vsub.f32 1.0, %v1015_v21  ;;  %v423_v28 = vmul.f32 %v1015_v21, %v421_v25  ;;  %v1407_v25 = vadd.f32 %v1307_v45, %v1331_v61 }
 0x1f7   :  { %v417_v19 = vadd.f32 %v416_v16, %v1311_v49 }
 0x1f9   :  { %1016 = vtanh.f32 %v417_v19 }
 0x1ff   :  { %v1017_v26 = vpop.eup %1016 }
 0x200   :  { %v420_v29 = vmul.f32 %v1017_v26, %v419_v22 }
 0x202   :  { %v424_v31 = vadd.f32 %v423_v28, %v420_v29 }
 0x204   :  { %v426_v32 = vrot.slane %v424_v31, 4  ;;  %v515_v62 = vrot.slane %v424_v31, 6 }
 0x206   :  { %963 = vmatmul.msk.f32.vlgmr.msrb.gmra.mxu3 %vm149_vm1, %v426_v32  ;;  %964 = vmatmul.msk.f32.vlgmr.msrb.gmra.mxu0 %vm149_vm1, %v426_v32 }
 0x207   :  { %965 = vmatmul.msk.f32.vlgmr.msrb.gmra.mxu1 %vm149_vm1, %v426_v32  ;;  %658 = vmatpush.msrb.mxu3 %v1173_v8 }
 0x208   :  { %712 = vmatpush.msrb.mxu0 %v1139_v0  ;;  %732 = vmatpush.msrb.mxu1 %v1182_v10 }
 0x209   :  { %659 = vmatpush.msrb.mxu3 %v1188_v11 }
 0x20a   :  { %713 = vmatpush.msrb.mxu0 %v1144_v1  ;;  %733 = vmatpush.msrb.mxu1 %v1193_v12 }
 0x20b   :  { %660 = vmatpush.msrb.mxu3 %v1199_v13 }
 0x20c   :  { %714 = vmatpush.msrb.mxu0 %v1153_v3  ;;  %734 = vmatpush.msrb.mxu1 %v1219_v18 }
 0x20d   :  { %661 = vmatpush.msrb.mxu3 %v1214_v17 }
 0x20e   :  { %715 = vmatpush.msrb.mxu0 %v1168_v7  ;;  %735 = vmatpush.msrb.mxu1 %v1230_v20 }
 0x283   :  { %v466_v34 = vpop.f32.mrf.mxu0 }
 0x284   :  { %v467_v36 = vadd.f32 %v1292_v33, %v466_v34  ;;  %v486_v51 = vpop.f32.mrf.mxu1 }
 0x285   :  { %v487_v54 = vadd.f32 %v1302_v43, %v486_v51 }
 0x286   :  { %v499_v37 = vrot.slane %v467_v36, 2 }
 0x287   :  { %v508_v56 = vrot.slane %v487_v54, 2 }
 0x288   :  { %v501_v40 = vadd.f32 %v499_v37, %v1295_v35 }
 0x289   :  { %v446_v38 = vpop.f32.mrf.mxu3 }
 0x28a   :  { %v447_v39 = vadd.f32 %v1276_v23, %v446_v38  ;;  %v502_v44 = vsub.f32 0.0, %v501_v40 }
 0x28c   :  { %v490_v41 = vrot.slane %v447_v39, 2  ;;  %v503_v48 = vmul.f32 1.442695, %v502_v44 }
 0x28e   :  { %v492_v42 = vadd.f32 %v490_v41, %v1278_v24 }
 0x290   :  { %v493_v46 = vsub.f32 0.0, %v492_v42 }
 0x292   :  { %v494_v47 = vmul.f32 1.442695, %v493_v46 }
 0x294   :  { %1018 = vpow2.f32 %v494_v47 }
 0x295   :  { %1020 = vpow2.f32 %v503_v48 }
 0x29a   :  { %v1019_v50 = vpop.eup %1018 }
 0x29b   :  { %v496_v52 = vadd.f32 1.0, %v1019_v50  ;;  %v1021_v53 = vpop.eup %1020 }
 0x29c   :  { %v505_v55 = vadd.f32 1.0, %v1021_v53 }
 0x29d   :  { %1022 = vrcp.f32 %v496_v52 }
 0x29e   :  { %1024 = vrcp.f32 %v505_v55 }
 0x2a3   :  { %v1023_v57 = vpop.eup %1022 }
 0x2a4   :  { %v510_v35 = vmul.f32 %v1023_v57, %v508_v56  ;;  %v1025_v58 = vpop.eup %1024 }
 0x2a5   :  { %v513_v59 = vsub.f32 1.0, %v1025_v58  ;;  %v517_v2 = vmul.f32 %v1025_v58, %v515_v62 }
 0x2a6   :  { %v511_v24 = vadd.f32 %v510_v35, %v1311_v49  ;;  %v1398_v49 = vadd.f32 %v1287_v30, %v1329_v60 }
 0x2a8   :  { %1026 = vtanh.f32 %v511_v24 }
 0x2ae   :  { %v1027_v63 = vpop.eup %1026 }
 0x2af   :  { %v514_v4 = vmul.f32 %v1027_v63, %v513_v59 }
 0x2b1   :  { %v518_v5 = vadd.f32 %v517_v2, %v514_v4 }
 0x2b3   :  { %v520_v6 = vrot.slane %v518_v5, 6 }
 0x2b5   :  { %966 = vmatmul.msk.f32.vlgmr.msrb.gmra.mxu2 %vm149_vm1, %v520_v6  ;;  %967 = vmatmul.msk.f32.vlgmr.msra.gmra.mxu3 %vm149_vm1, %v520_v6 }
 0x2b6   :  { %968 = vmatmul.msk.f32.vlgmr.msra.gmra.mxu0 %vm149_vm1, %v520_v6  ;;  %752 = vmatpush.msrb.mxu2 %v1173_v8 }
 0x2b7   :  { %806 = vmatpush.msra.mxu3 %v1139_v0  ;;  %826 = vmatpush.msra.mxu0 %v1182_v10 }
 0x2b8   :  { %753 = vmatpush.msrb.mxu2 %v1188_v11 }
 0x2b9   :  { %807 = vmatpush.msra.mxu3 %v1144_v1  ;;  %827 = vmatpush.msra.mxu0 %v1193_v12 }
 0x2ba   :  { %754 = vmatpush.msrb.mxu2 %v1199_v13 }
 0x2bb   :  { %808 = vmatpush.msra.mxu3 %v1153_v3  ;;  %828 = vmatpush.msra.mxu0 %v1219_v18 }
 0x2bc   :  { %755 = vmatpush.msrb.mxu2 %v1214_v17 }
 0x2bd   :  { %809 = vmatpush.msra.mxu3 %v1168_v7  ;;  %829 = vmatpush.msra.mxu0 %v1230_v20 }
 0x333   :  { %v580_v30 = vpop.f32.mrf.mxu0 }
 0x334   :  { %v581_v21 = vadd.f32 %v1302_v43, %v580_v30 }
 0x338   :  { %v540_v0 = vpop.f32.mrf.mxu2  ;;  %v560_v10 = vpop.f32.mrf.mxu3 }
 0x339   :  { %v541_v1 = vadd.f32 %v1276_v23, %v540_v0  ;;  %v561_v12 = vadd.f32 %v1292_v33, %v560_v10 }
 0x33b   :  { %v583_v3 = vadd.f32 %v541_v1, %v1280_v27  ;;  %v589_v18 = vadd.f32 %v561_v12, %v1398_v49 }
 0x33d   :  { %v584_v9 = vsub.f32 0.0, %v583_v3  ;;  %v590_v14 = vsub.f32 0.0, %v589_v18 }
 0x33f   :  { %v585_v15 = vmul.f32 1.442695, %v584_v9  ;;  %v591_v7 = vmul.f32 1.442695, %v590_v14 }
 0x341   :  { %1028 = vpow2.f32 %v585_v15 }
 0x342   :  { %1030 = vpow2.f32 %v591_v7 }
 0x347   :  { %v1029_v20 = vpop.eup %1028 }
 0x348   :  { %v587_v16 = vadd.f32 1.0, %v1029_v20  ;;  %v1031_v19 = vpop.eup %1030 }
 0x349   :  { %v593_v60 = vadd.f32 1.0, %v1031_v19 }
 0x34a   :  { %1032 = vrcp.f32 %v587_v16 }
 0x34b   :  { %1034 = vrcp.f32 %v593_v60 }
 0x350   :  { %v1033_v22 = vpop.eup %1032 }
 0x351   :  { %v595_v26 = vmul.f32 %v1033_v22, %v581_v21  ;;  %v1035_v29 = vpop.eup %1034 }
 0x352   :  { %v598_v31 = vsub.f32 1.0, %v1035_v29  ;;  %v601_v34 = vmul.f32 %v1035_v29, %v520_v6 }
 0x353   :  { %v596_v28 = vadd.f32 %v595_v26, %v1407_v25 }
 0x355   :  { %1036 = vtanh.f32 %v596_v28 }
 0x35b   :  { %v1037_v32 = vpop.eup %1036 }
 0x35c   :  { %v599_v36 = vmul.f32 %v1037_v32, %v598_v31 }
 0x35e   :  { %v602_v37 = vadd.f32 %v601_v34, %v599_v36 }
 0x360   :  { %969 = vmatmul.msk.f32.vlgmr.msra.gmra.mxu1 %vm149_vm1, %v602_v37  ;;  %970 = vmatmul.msk.f32.vlgmr.msra.gmra.mxu2 %vm149_vm1, %v602_v37  ;;  %v692_v24 = vrot.slane %v602_v37, 6 }
 0x361   :  { %971 = vmatmul.msk.f32.vlgmr.msrb.gmra.mxu3 %vm149_vm1, %v602_v37  ;;  %846 = vmatpush.msra.mxu1 %v1173_v8 }
 0x363   :  { %847 = vmatpush.msra.mxu1 %v1188_v11 }
 0x365   :  { %848 = vmatpush.msra.mxu1 %v1199_v13 }
 0x367   :  { %849 = vmatpush.msra.mxu1 %v1214_v17 }
 0x3dd   :  { %v623_v45 = vpop.f32.mrf.mxu1 }
 0x3de   :  { %v624_v61 = vadd.f32 %v1276_v23, %v623_v45 }
 0x3e0   :  { %v667_v38 = vrot.slane %v624_v61, 6 }
 0x3e2   :  { %v669_v39 = vadd.f32 %v667_v38, %v1280_v27 }
 0x3e3   :  { %v643_v40 = vpop.f32.mrf.mxu2 }
 0x3e4   :  { %v670_v41 = vsub.f32 0.0, %v669_v39  ;;  %v644_v42 = vadd.f32 %v1292_v33, %v643_v40  ;;  %v663_v48 = vpop.f32.mrf.mxu3 }
 0x3e5   :  { %v664_v50 = vadd.f32 %v1302_v43, %v663_v48 }
 0x3e6   :  { %v671_v44 = vmul.f32 1.442695, %v670_v41  ;;  %v676_v46 = vrot.slane %v644_v42, 6  ;;  %v888_v41 = vld [vmem:[%s1465_s5 + $0x18] sm:$0xff]  ;;  %v887_v42 = vld [vmem:[%s1465_s5 + $0x10] sm:$0xff] }
 0x3e7   :  { %v685_v53 = vrot.slane %v664_v50, 6  ;;  %909 = vmatpush.msra.mxu2 %v888_v41 }
 0x3e8   :  { %1038 = vpow2.f32 %v671_v44  ;;  %v678_v8 = vadd.f32 %v676_v46, %v1398_v49 }
 0x3e9   :  { %910 = vmatpush.msra.mxu2 %v887_v42 }
 0x3ea   :  { %v679_v11 = vsub.f32 0.0, %v678_v8  ;;  %v886_v8 = vld [vmem:[%s1465_s5 + $0x8] sm:$0xff] }
 0x3eb   :  { %911 = vmatpush.msra.mxu2 %v886_v8 }
 0x3ec   :  { %v680_v47 = vmul.f32 1.442695, %v679_v11 }
 0x3ee   :  { %v1039_v13 = vpop.eup %1038  ;;  %1040 = vpow2.f32 %v680_v47  ;;  %v885_v47 = vld [vmem:[%s1465_s5] sm:$0xff] }
 0x3ef   :  { %v673_v17 = vadd.f32 1.0, %v1039_v13  ;;  %912 = vmatpush.msra.mxu2 %v885_v47 }
 0x3f1   :  { %1042 = vrcp.f32 %v673_v17 }
 0x3f4   :  { %v1041_v51 = vpop.eup %1040 }
 0x3f5   :  { %v682_v52 = vadd.f32 1.0, %v1041_v51 }
 0x3f7   :  { %v1043_v54 = vpop.eup %1042  ;;  %1044 = vrcp.f32 %v682_v52 }
 0x3f8   :  { %v687_v55 = vmul.f32 %v1043_v54, %v685_v53 }
 0x3fa   :  { %v688_v56 = vadd.f32 %v687_v55, %v1407_v25 }
 0x3fc   :  { %1046 = vtanh.f32 %v688_v56 }
 0x3fd   :  { %v1045_v57 = vpop.eup %1044 }
 0x3fe   :  { %v690_v35 = vsub.f32 1.0, %v1045_v57  ;;  %v694_v59 = vmul.f32 %v1045_v57, %v692_v24 }
 0x402   :  { %v1047_v58 = vpop.eup %1046 }
 0x403   :  { %v691_v62 = vmul.f32 %v1047_v58, %v690_v35 }
 0x405   :  { %v695_v63 = vadd.f32 %v694_v59, %v691_v62 }
 0x407   :  { %v697_v2 = vrot.slane %v695_v63, 2  ;;  %v786_v32 = vrot.slane %v695_v63, 6 }
 0x409   :  { %972 = vmatmul.msk.f32.vlgmr.msrb.gmra.mxu0 %vm149_vm1, %v697_v2  ;;  %973 = vmatmul.msk.f32.vlgmr.msrb.gmra.mxu1 %vm149_vm1, %v697_v2 }
 0x40a   :  { %974 = vmatmul.msk.f32.vlgmr.msrb.gmra.mxu2 %vm149_vm1, %v697_v2 }
 0x486   :  { %v717_v4 = vpop.f32.mrf.mxu0  ;;  %v737_v5 = vpop.f32.mrf.mxu1 }
 0x487   :  { %v718_v6 = vadd.f32 %v1276_v23, %v717_v4  ;;  %v738_v0 = vadd.f32 %v1292_v33, %v737_v5 }
 0x489   :  { %v761_v10 = vrot.slane %v718_v6, 4  ;;  %v770_v1 = vrot.slane %v738_v0, 4 }
 0x48b   :  { %v763_v12 = vadd.f32 %v761_v10, %v1280_v27  ;;  %v772_v3 = vadd.f32 %v770_v1, %v1398_v49 }
 0x48d   :  { %v764_v18 = vsub.f32 0.0, %v763_v12  ;;  %v773_v9 = vsub.f32 0.0, %v772_v3  ;;  %v757_v16 = vpop.f32.mrf.mxu2 }
 0x48e   :  { %v758_v30 = vadd.f32 %v1302_v43, %v757_v16 }
 0x48f   :  { %v765_v14 = vmul.f32 1.442695, %v764_v18  ;;  %v774_v15 = vmul.f32 1.442695, %v773_v9 }
 0x490   :  { %v779_v21 = vrot.slane %v758_v30, 4 }
 0x491   :  { %1048 = vpow2.f32 %v765_v14 }
 0x492   :  { %1050 = vpow2.f32 %v774_v15 }
 0x497   :  { %v1049_v7 = vpop.eup %1048 }
 0x498   :  { %v767_v20 = vadd.f32 1.0, %v1049_v7  ;;  %v1051_v19 = vpop.eup %1050 }
 0x499   :  { %v776_v60 = vadd.f32 1.0, %v1051_v19 }
 0x49a   :  { %1052 = vrcp.f32 %v767_v20 }
 0x49b   :  { %1054 = vrcp.f32 %v776_v60 }
 0x4a0   :  { %v1053_v22 = vpop.eup %1052 }
 0x4a1   :  { %v781_v26 = vmul.f32 %v1053_v22, %v779_v21  ;;  %v1055_v29 = vpop.eup %1054 }
 0x4a2   :  { %v784_v31 = vsub.f32 1.0, %v1055_v29  ;;  %v788_v36 = vmul.f32 %v1055_v29, %v786_v32 }
 0x4a3   :  { %v782_v28 = vadd.f32 %v781_v26, %v1407_v25 }
 0x4a5   :  { %1056 = vtanh.f32 %v782_v28 }
 0x4ab   :  { %v1057_v34 = vpop.eup %1056 }
 0x4ac   :  { %v785_v37 = vmul.f32 %v1057_v34, %v784_v31 }
 0x4ae   :  { %v789_v45 = vadd.f32 %v788_v36, %v785_v37 }
 0x4b0   :  { %v791_v61 = vrot.slane %v789_v45, 4  ;;  %v880_v59 = vrot.slane %v789_v45, 6 }
 0x4b2   :  { %975 = vmatmul.msk.f32.vlgmr.msra.gmra.mxu3 %vm149_vm1, %v791_v61  ;;  %976 = vmatmul.msk.f32.vlgmr.msra.gmra.mxu0 %vm149_vm1, %v791_v61 }
 0x4b3   :  { %977 = vmatmul.msk.f32.vlgmr.msra.gmra.mxu1 %vm149_vm1, %v791_v61 }
 0x52f   :  { %v831_v38 = vpop.f32.mrf.mxu0 }
 0x530   :  { %v832_v39 = vadd.f32 %v1292_v33, %v831_v38  ;;  %v851_v52 = vpop.f32.mrf.mxu1 }
 0x531   :  { %v852_v54 = vadd.f32 %v1302_v43, %v851_v52  ;;  %v987_v43 = vld [vmem:[%s1466_s6] ss:$0 sm:$0xff] }
 0x532   :  { %v864_v40 = vrot.slane %v832_v39, 2 }
 0x533   :  { %v873_v56 = vrot.slane %v852_v54, 2 }
 0x534   :  { %v866_v11 = vadd.f32 %v864_v40, %v1398_v49 }
 0x535   :  { %v811_v44 = vpop.f32.mrf.mxu3 }
 0x536   :  { %v812_v46 = vadd.f32 %v1276_v23, %v811_v44  ;;  %v867_v17 = vsub.f32 0.0, %v866_v11 }
 0x538   :  { %v855_v33 = vrot.slane %v812_v46, 2  ;;  %v868_v23 = vmul.f32 1.442695, %v867_v17 }
 0x53a   :  { %v857_v13 = vadd.f32 %v855_v33, %v1280_v27 }
 0x53c   :  { %v858_v48 = vsub.f32 0.0, %v857_v13 }
 0x53e   :  { %v859_v50 = vmul.f32 1.442695, %v858_v48 }
 0x540   :  { %1058 = vpow2.f32 %v859_v50 }
 0x541   :  { %1060 = vpow2.f32 %v868_v23 }
 0x546   :  { %v1059_v51 = vpop.eup %1058 }
 0x547   :  { %v861_v53 = vadd.f32 1.0, %v1059_v51  ;;  %v1061_v49 = vpop.eup %1060 }
 0x548   :  { %v870_v55 = vadd.f32 1.0, %v1061_v49 }
 0x549   :  { %1062 = vrcp.f32 %v861_v53 }
 0x54a   :  { %1064 = vrcp.f32 %v870_v55 }
 0x54f   :  { %v1063_v57 = vpop.eup %1062 }
 0x550   :  { %v875_v35 = vmul.f32 %v1063_v57, %v873_v56  ;;  %v1065_v24 = vpop.eup %1064 }
 0x551   :  { %v878_v58 = vsub.f32 1.0, %v1065_v24  ;;  %v882_v63 = vmul.f32 %v1065_v24, %v880_v59 }
 0x552   :  { %v876_v27 = vadd.f32 %v875_v35, %v1407_v25 }
 0x554   :  { %1066 = vtanh.f32 %v876_v27 }
 0x55a   :  { %v1067_v62 = vpop.eup %1066 }
 0x55b   :  { %v879_v2 = vmul.f32 %v1067_v62, %v878_v58 }
 0x55d   :  { %v883_v4 = vadd.f32 %v882_v63, %v879_v2 }
 0x55f   :  { %v884_v5 = vmax.f32 %v883_v4, 0.0 }
 0x561   :  { %v894_v6 = vrot.slane %v884_v5, 6 }
 0x563   :  { %978 = vmatmul.msk.f32.vlgmr.msra.gmra.mxu2 %vm149_vm1, %v894_v6 }
 0x5e6   :  { %v914_v25 = vpop.f32.mrf.mxu2 }
 0x5e7   :  { %v915_v0 = vadd.f32 %v987_v43, %v914_v25 }
 0x5e9   :  { %918 = vst.msk [vmem:[#allocation2] sm:$0x3] %vm917_vm2, %v915_v0 }
 0x5ea   :  { %929 = dma.vmem_to_hbm [thread:$0]  %s925_s12, 32, %s927_s1, [#allocation3]  }
 0x5eb   :  { %1092 = dma.done.wait [#allocation3], 32  }
 0x5ec   :  { %1093 = vsyncadd [#allocation3], 4294967264 }
 0x5ed   :  { %934 = vsyncpa [#allocation3], 1 }

</bundles_post_ra>
